<compile_context>
chip_gen: v7x
topology: tpu7x:2x2x1
jax: 0.10.0
libtpu: 0.0.40
codegen_flags: <defaults>
</compile_context>

<pallas_src>
import math
from functools import partial

import jax
import jax.numpy as jnp
from jax import lax
from jax.experimental import pallas as pl
from jax.experimental.pallas import tpu as pltpu


# ---------------------------------------------------------------------------
# Divergence-dependent scalar functions (static Python branching, traced once)
# ---------------------------------------------------------------------------
def _activation_fns(divergence):
    """Returns (g, g') for Activation_g."""
    if divergence in ("KLD", "CHI"):
        return (lambda v: v), (lambda v: jnp.ones_like(v))
    if divergence == "RKL":
        return (lambda v: -jnp.exp(-v)), (lambda v: jnp.exp(-v))
    if divergence == "SQH":
        return (lambda v: 1.0 - jnp.exp(-v)), (lambda v: jnp.exp(-v))
    if divergence == "JSD":
        log2 = math.log(2.0)
        return (lambda v: log2 - jnp.log(1.0 + jnp.exp(-v))), (
            lambda v: jnp.exp(-v) / (1.0 + jnp.exp(-v)))
    if divergence == "GAN":
        return (lambda v: -jnp.log(1.0 + jnp.exp(-v))), (
            lambda v: jnp.exp(-v) / (1.0 + jnp.exp(-v)))
    raise ValueError(divergence)


def _conjugate_double_prime_fn(divergence):
    """Returns f'' for Conjugate_double_prime."""
    if divergence == "KLD":
        return lambda t: jnp.exp(t - 1.0)
    if divergence == "RKL":
        return lambda t: 1.0 / (t * t)
    if divergence == "CHI":
        return lambda t: 0.5 * jnp.ones_like(t)
    if divergence == "SQH":
        return lambda t: 2.0 * t / (1.0 - t) ** 3 + 2.0 / (1.0 - t) ** 2
    if divergence == "JSD":
        return lambda t: 2.0 * jnp.exp(t) / (2.0 - jnp.exp(t)) ** 2
    if divergence == "GAN":
        return lambda t: jnp.exp(t) / (1.0 - jnp.exp(t)) ** 2
    raise ValueError(divergence)


def _round_up(x, m):
    return ((x + m - 1) // m) * m


# ---------------------------------------------------------------------------
# Pallas kernel
# ---------------------------------------------------------------------------
def _make_regloss_kernel(divergence, batch_size, tb, needs_mask):
    g_fn, gp_fn = _activation_fns(divergence)
    fdd_fn = _conjugate_double_prime_fn(divergence)

    def kernel(x_ref, w1_ref, b1_ref, w2_ref, gram_ref, b2_ref, out_ref):
        i = pl.program_id(0)

        x = x_ref[...]            # (TB, D)   bf16 or f32
        w1 = w1_ref[...]          # (D, H)    bf16 or f32  (resident)
        b1 = b1_ref[...]          # (1, H)    f32
        w2 = w2_ref[...]          # (1, H)    f32  (row layout of (H,1) weight)
        gram = gram_ref[...]      # (H, H)    f32  (W1^T @ W1, resident)
        b2 = b2_ref[0, 0]         # scalar    f32  (SMEM)

        # --- discriminator forward: the only large MXU pass (f32 accumulate) ---
        h = jnp.dot(x, w1, preferred_element_type=jnp.float32) + b1     # (TB, H)
        a = jnp.tanh(h)                                                  # (TB, H)
        # (TB,H)x(H,1) projection done on VPU + lane reduce (keeps MXU free)
        v = jnp.sum(a * w2, axis=1, keepdims=True) + b2                  # (TB, 1)

        # --- per-sample gradient norm of T = g(disc(x)) wrt flattened input ---
        # ||gp * da @ W1^T||  =  |gp| * sqrt( rowsum((da @ G) * da) ),  G = W1^T W1
        gp = gp_fn(v)                                                    # (TB, 1)
        da = (1.0 - a * a) * w2                                          # (TB, H)
        q = jnp.dot(da, gram, preferred_element_type=jnp.float32)        # (TB, H)
        sq = jnp.maximum(jnp.sum(q * da, axis=1, keepdims=True), 0.0)    # (TB, 1)
        grad_norm = jnp.abs(gp) * jnp.sqrt(sq)                           # (TB, 1)

        # --- regularizer ---
        t = g_fn(v)                                                      # (TB, 1)
        fdd = fdd_fn(t)                                                  # (TB, 1)
        vals = grad_norm * fdd * fdd                                     # (TB, 1)

        if needs_mask:  # mask padded batch rows in the tail tile (static branch)
            rows = lax.broadcasted_iota(jnp.int32, vals.shape, 0) + i * tb
            vals = jnp.where(rows < batch_size, vals, 0.0)

        partial_sum = jnp.sum(vals, axis=0, keepdims=True)               # (1, 1)
        out_ref[...] = partial_sum[None, :, :]                           # (1, 1, 1)

    return kernel


# ---------------------------------------------------------------------------
# Wrapper
# ---------------------------------------------------------------------------
@partial(jax.jit, static_argnames=("divergence", "tb", "use_bf16"))
def regloss_pallas(fake_data, w1, b1, w2_row, b2, *, divergence="KLD",
                   tb=None, use_bf16=True):
    """REGLOSS.forward(disc, fake_data) with disc = fixed 2-layer MLP."""
    b = fake_data.shape[0]
    d = math.prod(fake_data.shape[1:])
    hdim = w1.shape[1]

    x = fake_data.reshape(b, d).astype(jnp.float32)      # torch .view(B, -1)
    w1f = w1.astype(jnp.float32)
    # H x H Gram matrix replaces the D-wide backward matmul inside the kernel.
    gram = jnp.dot(w1f.T, w1f, preferred_element_type=jnp.float32)

    mxu_dtype = jnp.bfloat16 if use_bf16 else jnp.float32
    itm = 2 if use_bf16 else 4

    # Batch tile: as large as possible (amortize ~0.35us/step + feed the MXU)
    # while double-buffered x tiles + resident W1 fit a conservative VMEM
    # budget (safe even under v7x's smaller VMEM).
    if tb is None:
        budget = 24 * 1024 * 1024
        avail = max(budget - d * hdim * itm, 2 * 16 * d * itm)
        tb_cap = max(16, (avail // (2 * d * itm)) // 16 * 16)
        tb = min(512, _round_up(b, 16), tb_cap)

    b_pad = _round_up(b, tb)
    n_tiles = b_pad // tb
    needs_mask = b_pad != b
    if needs_mask:
        x = jnp.concatenate([x, jnp.zeros((b_pad - b, d), x.dtype)], axis=0)

    x_in = x.astype(mxu_dtype)
    w1_in = w1f.astype(mxu_dtype)
    b1_in = b1.reshape(1, hdim).astype(jnp.float32)
    w2_in = w2_row.reshape(1, hdim).astype(jnp.float32)
    b2_in = b2.reshape(1, 1).astype(jnp.float32)

    kernel = _make_regloss_kernel(divergence, b, tb, needs_mask)

    partials = pl.pallas_call(
        kernel,
        out_shape=jax.ShapeDtypeStruct((n_tiles, 1, 1), jnp.float32),
        grid_spec=pltpu.PrefetchScalarGridSpec(
            num_scalar_prefetch=0,
            grid=(n_tiles,),
            in_specs=[
                pl.BlockSpec((tb, d), lambda i: (i, 0)),        # x tile over batch
                pl.BlockSpec((d, hdim), lambda i: (0, 0)),      # W1 (resident)
                pl.BlockSpec((1, hdim), lambda i: (0, 0)),      # b1
                pl.BlockSpec((1, hdim), lambda i: (0, 0)),      # W2 row
                pl.BlockSpec((hdim, hdim), lambda i: (0, 0)),   # Gram = W1^T W1
                pl.BlockSpec(memory_space=pltpu.MemorySpace.SMEM),  # b2 scalar
            ],
            # one independent (1,1,1) partial-sum block per tile -> no
            # cross-step accumulator, grid axis can be truly parallel (megacore)
            out_specs=pl.BlockSpec((1, 1, 1), lambda i: (i, 0, 0)),
        ),
        compiler_params=pltpu.CompilerParams(
            dimension_semantics=("parallel",),
            vmem_limit_bytes=32 * 1024 * 1024,
        ),
    )(x_in, w1_in, b1_in, w2_in, gram, b2_in)

    return jnp.sum(partials) / b


# ---------------------------------------------------------------------------
# Pure-JAX reference (uses autodiff for the per-sample jacobian, like PyTorch)
# ---------------------------------------------------------------------------
def regloss_reference(fake_data, w1, b1, w2_row, b2, divergence="KLD"):
    g_fn, _ = _activation_fns(divergence)
    fdd_fn = _conjugate_double_prime_fn(divergence)
    bsz = fake_data.shape[0]
    x = fake_data.reshape(bsz, -1).astype(jnp.float32)

    def T_single(xi):  # scalar-output T for one sample
        v = jnp.tanh(xi @ w1 + b1[0]) @ w2_row[0] + b2[0, 0]
        return g_fn(v)

    grad_T = jax.vmap(jax.grad(T_single))(x)                       # (B, D)
    grad_norm = jnp.linalg.norm(grad_T, axis=1, keepdims=True)     # (B, 1)
    t = jax.vmap(T_single)(x)[:, None]                             # (B, 1)
    fdd = fdd_fn(t)
    return jnp.mean(grad_norm * fdd ** 2)


# ---------------------------------------------------------------------------
if __name__ == "__main__":
    key = jax.random.PRNGKey(0)
    k_x, k_w1, k_b1, k_w2, k_b2 = jax.random.split(key, 5)

    # fake_data: NCHW like PyTorch.
    B, C, H, W = 8, 4, 16, 16
    D = C * H * W          # 1024
    HID = 32               # hidden width of the synthetic discriminator

    fake_data = jax.random.normal(k_x, (B, C, H, W), dtype=jnp.float32)
    w1 = jax.random.normal(k_w1, (D, HID), dtype=jnp.float32) * (1.0 / math.sqrt(D))
    b1 = jax.random.normal(k_b1, (1, HID), dtype=jnp.float32) * 0.01
    w2_row = jax.random.normal(k_w2, (1, HID), dtype=jnp.float32) * (1.0 / math.sqrt(HID))
    b2 = jax.random.normal(k_b2, (1, 1), dtype=jnp.float32) * 0.01

    divergence = "KLD"
    # TODO(synk): REGLOSS is generic over an arbitrary `disc` nn.Module; only the
    # fixed MLP discriminator above is implemented in-kernel.

    ref = regloss_reference(fake_data, w1, b1, w2_row, b2, divergence=divergence)

    # f32 MXU path: bit-level math check against the autodiff reference.
    out_f32 = regloss_pallas(fake_data, w1, b1, w2_row, b2,
                             divergence=divergence, use_bf16=False)
    out_f32 = jax.block_until_ready(out_f32)
    assert jnp.allclose(out_f32, ref, rtol=2e-4, atol=1e-5), (out_f32, ref)

    # bf16 MXU path (default, memory-bound fast path): looser tolerance.
    out_bf16 = regloss_pallas(fake_data, w1, b1, w2_row, b2,
                              divergence=divergence, use_bf16=True)
    out_bf16 = jax.block_until_ready(out_bf16)
    assert jnp.allclose(out_bf16, ref, rtol=5e-2, atol=1e-3), (out_bf16, ref)

    print("KERNEL_OK")
</pallas_src>

<mosaic_0001>
module attributes {stable_mosaic.version = 11 : i64} {
  func.func @kernel(%arg0: i32, %arg1: memref<16x1024xf32, #tpu.memory_space<vmem>>, %arg2: memref<1024x32xf32, #tpu.memory_space<vmem>>, %arg3: memref<1x32xf32, #tpu.memory_space<vmem>>, %arg4: memref<1x32xf32, #tpu.memory_space<vmem>>, %arg5: memref<32x32xf32, #tpu.memory_space<vmem>>, %arg6: memref<1x1xf32, #tpu.memory_space<smem>>, %arg7: memref<1x1x1xf32, #tpu.memory_space<vmem>>) attributes {dimension_semantics = [#tpu.dimension_semantics<parallel>], iteration_bounds = array<i64: 1>, scalar_prefetch = 0 : i64, scratch_operands = 0 : i64, tpu.core_type = #tpu.core_type<tc>, window_params = [{transform_indices = @transform_0, window_bounds = array<i64: 16, 1024>}, {pipeline_mode = #tpu.pipeline_mode<synchronous>, transform_indices = @transform_1, window_bounds = array<i64: 1024, 32>}, {pipeline_mode = #tpu.pipeline_mode<synchronous>, transform_indices = @transform_2, window_bounds = array<i64: 1, 32>}, {pipeline_mode = #tpu.pipeline_mode<synchronous>, transform_indices = @transform_3, window_bounds = array<i64: 1, 32>}, {pipeline_mode = #tpu.pipeline_mode<synchronous>, transform_indices = @transform_4, window_bounds = array<i64: 32, 32>}, {transform_indices = @transform_5, window_bounds = array<i64: 1, 1>}, {transform_indices = @transform_6, window_bounds = array<i64: 1, 1, 1>}]} {
    %c0 = arith.constant 0 : index
    %c0_0 = arith.constant 0 : index
    %0 = vector.load %arg1[%c0, %c0_0] : memref<16x1024xf32, #tpu.memory_space<vmem>>, vector<16x1024xf32>
    %c0_1 = arith.constant 0 : index
    %c0_2 = arith.constant 0 : index
    %1 = vector.load %arg2[%c0_1, %c0_2] : memref<1024x32xf32, #tpu.memory_space<vmem>>, vector<1024x32xf32>
    %c0_3 = arith.constant 0 : index
    %c0_4 = arith.constant 0 : index
    %2 = vector.load %arg3[%c0_3, %c0_4] : memref<1x32xf32, #tpu.memory_space<vmem>>, vector<1x32xf32>
    %c0_5 = arith.constant 0 : index
    %c0_6 = arith.constant 0 : index
    %3 = vector.load %arg4[%c0_5, %c0_6] : memref<1x32xf32, #tpu.memory_space<vmem>>, vector<1x32xf32>
    %c0_7 = arith.constant 0 : index
    %c0_8 = arith.constant 0 : index
    %4 = vector.load %arg5[%c0_7, %c0_8] : memref<32x32xf32, #tpu.memory_space<vmem>>, vector<32x32xf32>
    %c0_9 = arith.constant 0 : index
    %c0_10 = arith.constant 0 : index
    %5 = memref.load %arg6[%c0_9, %c0_10] : memref<1x1xf32, #tpu.memory_space<smem>>
    %cst = arith.constant dense<0.000000e+00> : vector<16x32xf32>
    %6 = tpu.matmul %0, %1, %cst {dimension_numbers = #tpu.dot_dimension_numbers<[1], [0], [0], [1], [0, 0, 1, 1], [], []>} : vector<16x1024xf32>, vector<1024x32xf32>, vector<16x32xf32> -> vector<16x32xf32>
    %7 = vector.broadcast %2 : vector<1x32xf32> to vector<16x32xf32>
    %8 = arith.addf %6, %7 : vector<16x32xf32>
    %9 = math.tanh %8 : vector<16x32xf32>
    %10 = vector.broadcast %3 : vector<1x32xf32> to vector<16x32xf32>
    %11 = arith.mulf %9, %10 : vector<16x32xf32>
    %cst_11 = arith.constant dense<0.000000e+00> : vector<16xf32>
    %12 = vector.multi_reduction <add>, %11, %cst_11 [1] : vector<16x32xf32> to vector<16xf32>
    %13 = vector.shape_cast %12 : vector<16xf32> to vector<16x1xf32>
    %14 = vector.broadcast %5 : f32 to vector<16x1xf32>
    %15 = arith.addf %13, %14 : vector<16x1xf32>
    %cst_12 = arith.constant 1.000000e+00 : f32
    %16 = vector.broadcast %cst_12 : f32 to vector<16x1xf32>
    %17 = arith.mulf %9, %9 : vector<16x32xf32>
    %cst_13 = arith.constant 1.000000e+00 : f32
    %18 = vector.broadcast %cst_13 : f32 to vector<16x32xf32>
    %19 = arith.subf %18, %17 : vector<16x32xf32>
    %20 = vector.broadcast %3 : vector<1x32xf32> to vector<16x32xf32>
    %21 = arith.mulf %19, %20 : vector<16x32xf32>
    %cst_14 = arith.constant dense<0.000000e+00> : vector<16x32xf32>
    %22 = tpu.matmul %21, %4, %cst_14 {dimension_numbers = #tpu.dot_dimension_numbers<[1], [0], [0], [1], [0, 0, 1, 1], [], []>} : vector<16x32xf32>, vector<32x32xf32>, vector<16x32xf32> -> vector<16x32xf32>
    %23 = arith.mulf %22, %21 : vector<16x32xf32>
    %cst_15 = arith.constant dense<0.000000e+00> : vector<16xf32>
    %24 = vector.multi_reduction <add>, %23, %cst_15 [1] : vector<16x32xf32> to vector<16xf32>
    %25 = vector.shape_cast %24 : vector<16xf32> to vector<16x1xf32>
    %cst_16 = arith.constant 0.000000e+00 : f32
    %26 = vector.broadcast %cst_16 : f32 to vector<16x1xf32>
    %27 = arith.maximumf %25, %26 : vector<16x1xf32>
    %28 = math.absf %16 : vector<16x1xf32>
    %29 = math.sqrt %27 : vector<16x1xf32>
    %30 = arith.mulf %28, %29 : vector<16x1xf32>
    %cst_17 = arith.constant 1.000000e+00 : f32
    %31 = vector.broadcast %cst_17 : f32 to vector<16x1xf32>
    %32 = arith.subf %15, %31 : vector<16x1xf32>
    %33 = math.exp %32 : vector<16x1xf32>
    %34 = arith.mulf %30, %33 : vector<16x1xf32>
    %35 = arith.mulf %34, %33 : vector<16x1xf32>
    %36 = tpu.iota {dimensions = array<i32: 0>} : vector<16x1xi32>
    %c16_i32 = arith.constant 16 : i32
    %37 = arith.muli %arg0, %c16_i32 : i32
    %38 = vector.broadcast %37 : i32 to vector<16x1xi32>
    %39 = arith.addi %36, %38 : vector<16x1xi32>
    %c8_i32 = arith.constant 8 : i32
    %40 = vector.broadcast %c8_i32 : i32 to vector<16x1xi32>
    %41 = arith.cmpi slt, %39, %40 : vector<16x1xi32>
    %cst_18 = arith.constant 0.000000e+00 : f32
    %42 = vector.broadcast %cst_18 : f32 to vector<16x1xf32>
    %43 = arith.select %41, %35, %42 : vector<16x1xi1>, vector<16x1xf32>
    %cst_19 = arith.constant dense<0.000000e+00> : vector<1xf32>
    %44 = vector.multi_reduction <add>, %43, %cst_19 [0] : vector<16x1xf32> to vector<1xf32>
    %45 = vector.shape_cast %44 : vector<1xf32> to vector<1x1xf32>
    %46 = vector.shape_cast %45 : vector<1x1xf32> to vector<1x1x1xf32>
    %c0_20 = arith.constant 0 : index
    %c0_21 = arith.constant 0 : index
    %c0_22 = arith.constant 0 : index
    %47 = vector.load %arg7[%c0_20, %c0_21, %c0_22] : memref<1x1x1xf32, #tpu.memory_space<vmem>>, vector<1x1x1xf32>
    tpu.vector_store %arg7[%c0_20, %c0_21, %c0_22], %46 {strides = array<i32>} : memref<1x1x1xf32, #tpu.memory_space<vmem>>, vector<1x1x1xf32>,
    return
  }
  func.func @transform_0(%arg0: i32) -> (i32, i32) {
    %c0_i32 = arith.constant 0 : i32
    %c0_i32_0 = arith.constant 0 : i32
    return %arg0, %c0_i32 : i32, i32
  }
  func.func @transform_1(%arg0: i32) -> (i32, i32) {
    %c0_i32 = arith.constant 0 : i32
    %c0_i32_0 = arith.constant 0 : i32
    %c0_i32_1 = arith.constant 0 : i32
    return %c0_i32, %c0_i32_0 : i32, i32
  }
  func.func @transform_2(%arg0: i32) -> (i32, i32) {
    %c0_i32 = arith.constant 0 : i32
    %c0_i32_0 = arith.constant 0 : i32
    %c0_i32_1 = arith.constant 0 : i32
    return %c0_i32, %c0_i32_0 : i32, i32
  }
  func.func @transform_3(%arg0: i32) -> (i32, i32) {
    %c0_i32 = arith.constant 0 : i32
    %c0_i32_0 = arith.constant 0 : i32
    %c0_i32_1 = arith.constant 0 : i32
    return %c0_i32, %c0_i32_0 : i32, i32
  }
  func.func @transform_4(%arg0: i32) -> (i32, i32) {
    %c0_i32 = arith.constant 0 : i32
    %c0_i32_0 = arith.constant 0 : i32
    %c0_i32_1 = arith.constant 0 : i32
    return %c0_i32, %c0_i32_0 : i32, i32
  }
  func.func @transform_5(%arg0: i32) -> (i32, i32) {
    %c0_i32 = arith.constant 0 : i32
    %c0_i32_0 = arith.constant 0 : i32
    %c0_i32_1 = arith.constant 0 : i32
    return %c0_i32, %c0_i32_0 : i32, i32
  }
  func.func @transform_6(%arg0: i32) -> (i32, i32, i32) {
    %c0_i32 = arith.constant 0 : i32
    %c0_i32_0 = arith.constant 0 : i32
    %c0_i32_1 = arith.constant 0 : i32
    return %arg0, %c0_i32, %c0_i32_0 : i32, i32, i32
  }
}

</mosaic_0001>

<bundles_post_ra>
// kernel: regloss_pallas.1
= control target key start
LH: loop header
LB: loop body
LE: loop exit
PB: predicated region body
PF: predicated region fallthrough
CT: control target
= control target key end

     0   :  { %s1506_s0 = inlined_call_operand.vmem [shape: f32[16,1024], index: 0, kind: input, shape index: {}]   ;;  %s1507_s1 = inlined_call_operand.vmem [shape: f32[1024,32], index: 1, kind: input, shape index: {}]   ;;  %s1508_s2 = inlined_call_operand.vmem [shape: f32[1,32], index: 2, kind: input, shape index: {}]   ;;  %s1509_s3 = inlined_call_operand.vmem [shape: f32[1,32], index: 3, kind: input, shape index: {}]   ;;  %s1510_s4 = inlined_call_operand.vmem [shape: f32[32,32], index: 4, kind: input, shape index: {}]   ;;  %s1511_s5 = inlined_call_operand.<no memory space> [shape: f32[1,1], index: 5, kind: input, shape index: {}]   ;;  %s1512_s6 = inlined_call_operand.hbm [shape: f32[1,1,1], index: 6, kind: output, shape index: {}]  }
   0x1   :  { %v57_v0 = vld [vmem:[%s1507_s1 + $0x80] sm:$0xff]  ;;  %v58_v1 = vld [vmem:[%s1507_s1 + $0x88] sm:$0xff]  ;;  %v59_v11 = vld [vmem:[%s1507_s1 + $0x90] sm:$0xff] }
   0x2   :  { %v41_v2 = vld [vmem:[%s1507_s1] sm:$0xff]  ;;  %v832_v3 = vpack.c.bf16 %v58_v1, %v57_v0  ;;  %v42_v4 = vld [vmem:[%s1507_s1 + $0x8] sm:$0xff]  ;;  %v60_v13 = vld [vmem:[%s1507_s1 + $0x98] sm:$0xff] }
   0x3   :  { %v89_v5 = vld [vmem:[%s1507_s1 + $0x180] sm:$0xff]  ;;  %v90_v6 = vld [vmem:[%s1507_s1 + $0x188] sm:$0xff]  ;;  %v834_v7 = vpack.c.bf16 %v42_v4, %v41_v2  ;;  %v43_v14 = vld [vmem:[%s1507_s1 + $0x10] sm:$0xff]  ;;  %v836_v16 = vpack.c.bf16 %v60_v13, %v59_v11 }
   0x4   :  { %v864_v8 = vpack.c.bf16 %v90_v6, %v89_v5  ;;  %v73_v9 = vld [vmem:[%s1507_s1 + $0x100] sm:$0xff]  ;;  %v74_v10 = vld [vmem:[%s1507_s1 + $0x108] sm:$0xff]  ;;  %833 = vmatprep.subr.bf16.mxu0 %v832_v3  ;;  %v44_v15 = vld [vmem:[%s1507_s1 + $0x18] sm:$0xff] }
   0x5   :  { %v866_v12 = vpack.c.bf16 %v74_v10, %v73_v9  ;;  %835 = vmatpush3.bf16.msra.mxu0 %v834_v7  ;;  %v838_v17 = vpack.c.bf16 %v44_v15, %v43_v14  ;;  %v91_v18 = vld [vmem:[%s1507_s1 + $0x190] sm:$0xff]  ;;  %v92_v19 = vld [vmem:[%s1507_s1 + $0x198] sm:$0xff]  ;;  %v61_v23 = vld [vmem:[%s1507_s1 + $0xa0] sm:$0xff] }
   0x6   :  { %865 = vmatprep.subr.bf16.mxu1 %v864_v8  ;;  %v75_v20 = vld [vmem:[%s1507_s1 + $0x110] sm:$0xff]  ;;  %v868_v21 = vpack.c.bf16 %v92_v19, %v91_v18  ;;  %v76_v22 = vld [vmem:[%s1507_s1 + $0x118] sm:$0xff]  ;;  %v62_v24 = vld [vmem:[%s1507_s1 + $0xa8] sm:$0xff]  ;;  %837 = vmatprep.subr.bf16.mxu0 %v836_v16 }
   0x7   :  { %867 = vmatpush3.bf16.msra.mxu1 %v866_v12  ;;  %v870_v25 = vpack.c.bf16 %v76_v22, %v75_v20  ;;  %v840_v26 = vpack.c.bf16 %v62_v24, %v61_v23  ;;  %v45_v27 = vld [vmem:[%s1507_s1 + $0x20] sm:$0xff]  ;;  %v46_v28 = vld [vmem:[%s1507_s1 + $0x28] sm:$0xff]  ;;  %v63_v35 = vld [vmem:[%s1507_s1 + $0xb0] sm:$0xff] }
   0x8   :  { %v93_v29 = vld [vmem:[%s1507_s1 + $0x1a0] sm:$0xff]  ;;  %869 = vmatprep.subr.bf16.mxu1 %v868_v21  ;;  %v94_v30 = vld [vmem:[%s1507_s1 + $0x1a8] sm:$0xff]  ;;  %v842_v33 = vpack.c.bf16 %v46_v28, %v45_v27  ;;  %v64_v36 = vld [vmem:[%s1507_s1 + $0xb8] sm:$0xff] }
   0x9   :  { %v77_v31 = vld [vmem:[%s1507_s1 + $0x120] sm:$0xff]  ;;  %v78_v32 = vld [vmem:[%s1507_s1 + $0x128] sm:$0xff]  ;;  %839 = vmatpush3.bf16.msra.mxu0 %v838_v17  ;;  %v872_v34 = vpack.c.bf16 %v94_v30, %v93_v29  ;;  %v47_v37 = vld [vmem:[%s1507_s1 + $0x30] sm:$0xff]  ;;  %v844_v39 = vpack.c.bf16 %v64_v36, %v63_v35 }
   0xa   :  { %841 = vmatprep.subr.bf16.mxu0 %v840_v26  ;;  %v874_v38 = vpack.c.bf16 %v78_v32, %v77_v31  ;;  %v48_v40 = vld [vmem:[%s1507_s1 + $0x38] sm:$0xff]  ;;  %v95_v41 = vld [vmem:[%s1507_s1 + $0x1b0] sm:$0xff]  ;;  %v65_v46 = vld [vmem:[%s1507_s1 + $0xc0] sm:$0xff] }
   0xb   :  { %871 = vmatpush3.bf16.msra.mxu1 %v870_v25  ;;  %v96_v42 = vld [vmem:[%s1507_s1 + $0x1b8] sm:$0xff]  ;;  %v79_v44 = vld [vmem:[%s1507_s1 + $0x130] sm:$0xff]  ;;  %v66_v47 = vld [vmem:[%s1507_s1 + $0xc8] sm:$0xff]  ;;  %v846_v48 = vpack.c.bf16 %v48_v40, %v47_v37 }
   0xc   :  { %873 = vmatprep.subr.bf16.mxu1 %v872_v34  ;;  %v876_v43 = vpack.c.bf16 %v96_v42, %v95_v41  ;;  %v80_v45 = vld [vmem:[%s1507_s1 + $0x138] sm:$0xff]  ;;  %v97_v49 = vld [vmem:[%s1507_s1 + $0x1c0] sm:$0xff]  ;;  %v98_v50 = vld [vmem:[%s1507_s1 + $0x1c8] sm:$0xff]  ;;  %v848_v52 = vpack.c.bf16 %v66_v47, %v65_v46 }
   0xd   :  { %843 = vmatpush3.bf16.msra.mxu0 %v842_v33  ;;  %v878_v51 = vpack.c.bf16 %v80_v45, %v79_v44  ;;  %v49_v53 = vld [vmem:[%s1507_s1 + $0x40] sm:$0xff]  ;;  %v50_v54 = vld [vmem:[%s1507_s1 + $0x48] sm:$0xff]  ;;  %v880_v56 = vpack.c.bf16 %v98_v50, %v97_v49  ;;  %v67_v58 = vld [vmem:[%s1507_s1 + $0xd0] sm:$0xff] }
   0xe   :  { %845 = vmatprep.subr.bf16.mxu0 %v844_v39  ;;  %v81_v55 = vld [vmem:[%s1507_s1 + $0x140] sm:$0xff]  ;;  %v82_v57 = vld [vmem:[%s1507_s1 + $0x148] sm:$0xff]  ;;  %v68_v59 = vld [vmem:[%s1507_s1 + $0xd8] sm:$0xff]  ;;  %v850_v62 = vpack.c.bf16 %v50_v54, %v49_v53 }
   0xf   :  { %875 = vmatpush3.bf16.msra.mxu1 %v874_v38  ;;  %v99_v60 = vld [vmem:[%s1507_s1 + $0x1d0] sm:$0xff]  ;;  %v100_v61 = vld [vmem:[%s1507_s1 + $0x1d8] sm:$0xff]  ;;  %v882_v63 = vpack.c.bf16 %v82_v57, %v81_v55  ;;  %v852_v0 = vpack.c.bf16 %v68_v59, %v67_v58  ;;  %v69_v6 = vld [vmem:[%s1507_s1 + $0xe0] sm:$0xff] }
  0x10   :  { %877 = vmatprep.subr.bf16.mxu1 %v876_v43  ;;  %v51_v1 = vld [vmem:[%s1507_s1 + $0x50] sm:$0xff]  ;;  %v52_v2 = vld [vmem:[%s1507_s1 + $0x58] sm:$0xff]  ;;  %v884_v4 = vpack.c.bf16 %v100_v61, %v99_v60  ;;  %v70_v7 = vld [vmem:[%s1507_s1 + $0xe8] sm:$0xff] }
  0x11   :  { %847 = vmatpush3.bf16.msra.mxu0 %v846_v48  ;;  %v83_v3 = vld [vmem:[%s1507_s1 + $0x150] sm:$0xff]  ;;  %v84_v5 = vld [vmem:[%s1507_s1 + $0x158] sm:$0xff]  ;;  %v101_v8 = vld [vmem:[%s1507_s1 + $0x1e0] sm:$0xff]  ;;  %v854_v10 = vpack.c.bf16 %v52_v2, %v51_v1  ;;  %v856_v14 = vpack.c.bf16 %v70_v7, %v69_v6 }
  0x12   :  { %849 = vmatprep.subr.bf16.mxu0 %v848_v52  ;;  %v102_v9 = vld [vmem:[%s1507_s1 + $0x1e8] sm:$0xff]  ;;  %v53_v11 = vld [vmem:[%s1507_s1 + $0x60] sm:$0xff]  ;;  %v886_v13 = vpack.c.bf16 %v84_v5, %v83_v3  ;;  %v71_v19 = vld [vmem:[%s1507_s1 + $0xf0] sm:$0xff] }
  0x13   :  { %879 = vmatpush3.bf16.msra.mxu1 %v878_v51  ;;  %v54_v12 = vld [vmem:[%s1507_s1 + $0x68] sm:$0xff]  ;;  %v85_v15 = vld [vmem:[%s1507_s1 + $0x160] sm:$0xff]  ;;  %v888_v18 = vpack.c.bf16 %v102_v9, %v101_v8  ;;  %v72_v20 = vld [vmem:[%s1507_s1 + $0xf8] sm:$0xff] }
  0x14   :  { %881 = vmatprep.subr.bf16.mxu1 %v880_v56  ;;  %v86_v16 = vld [vmem:[%s1507_s1 + $0x168] sm:$0xff]  ;;  %v28_v21 = vld [vmem:[%s1506_s0 + $0x18] sm:$0xff]  ;;  %v103_v22 = vld [vmem:[%s1507_s1 + $0x1f0] sm:$0xff]  ;;  %v858_v24 = vpack.c.bf16 %v54_v12, %v53_v11  ;;  %v860_v26 = vpack.c.bf16 %v72_v20, %v71_v19 }
  0x15   :  { %851 = vmatpush3.bf16.msra.mxu0 %v850_v62  ;;  %v26_v17 = vld [vmem:[%s1506_s0 + $0x8] sm:$0xff]  ;;  %v104_v23 = vld [vmem:[%s1507_s1 + $0x1f8] sm:$0xff]  ;;  %321 = vmatprep.mubr.f32.mxu1 %v28_v21  ;;  %v890_v25 = vpack.c.bf16 %v86_v16, %v85_v15  ;;  %v55_v27 = vld [vmem:[%s1507_s1 + $0x70] sm:$0xff] }
  0x16   :  { %853 = vmatprep.subr.bf16.mxu0 %v852_v0  ;;  %246 = vmatprep.mubr.f32.mxu0 %v26_v17  ;;  %v56_v28 = vld [vmem:[%s1507_s1 + $0x78] sm:$0xff]  ;;  %v87_v29 = vld [vmem:[%s1507_s1 + $0x170] sm:$0xff]  ;;  %v892_v30 = vpack.c.bf16 %v104_v23, %v103_v22  ;;  %v121_v32 = vld [vmem:[%s1507_s1 + $0x280] sm:$0xff] }
  0x17   :  { %883 = vmatpush3.bf16.msra.mxu1 %v882_v63  ;;  %v88_v31 = vld [vmem:[%s1507_s1 + $0x178] sm:$0xff]  ;;  %v122_v33 = vld [vmem:[%s1507_s1 + $0x288] sm:$0xff]  ;;  %v153_v34 = vld [vmem:[%s1507_s1 + $0x380] sm:$0xff]  ;;  %v862_v36 = vpack.c.bf16 %v56_v28, %v55_v27 }
  0x18   :  { %885 = vmatprep.subr.bf16.mxu1 %v884_v4  ;;  %v154_v35 = vld [vmem:[%s1507_s1 + $0x388] sm:$0xff]  ;;  %v894_v37 = vpack.c.bf16 %v88_v31, %v87_v29  ;;  %v896_v38 = vpack.c.bf16 %v122_v33, %v121_v32  ;;  %v105_v39 = vld [vmem:[%s1507_s1 + $0x200] sm:$0xff]  ;;  %v123_v44 = vld [vmem:[%s1507_s1 + $0x290] sm:$0xff] }
  0x19   :  { %855 = vmatpush3.bf16.msra.mxu0 %v854_v10  ;;  %v106_v40 = vld [vmem:[%s1507_s1 + $0x208] sm:$0xff]  ;;  %v137_v41 = vld [vmem:[%s1507_s1 + $0x300] sm:$0xff]  ;;  %v928_v42 = vpack.c.bf16 %v154_v35, %v153_v34  ;;  %v124_v45 = vld [vmem:[%s1507_s1 + $0x298] sm:$0xff] }
  0x1a   :  { %857 = vmatprep.subr.bf16.mxu0 %v856_v14  ;;  %v138_v43 = vld [vmem:[%s1507_s1 + $0x308] sm:$0xff]  ;;  %v155_v46 = vld [vmem:[%s1507_s1 + $0x390] sm:$0xff]  ;;  %v156_v47 = vld [vmem:[%s1507_s1 + $0x398] sm:$0xff]  ;;  %v898_v49 = vpack.c.bf16 %v106_v40, %v105_v39  ;;  %v900_v52 = vpack.c.bf16 %v124_v45, %v123_v44 }
  0x1b   :  { %887 = vmatpush3.bf16.msra.mxu1 %v886_v13  ;;  %v25_v48 = vld [vmem:[%s1506_s0] sm:$0xff]  ;;  %v27_v50 = vld [vmem:[%s1506_s0 + $0x10] sm:$0xff]  ;;  %v930_v51 = vpack.c.bf16 %v138_v43, %v137_v41  ;;  %v108_v54 = vld [vmem:[%s1507_s1 + $0x218] sm:$0xff]  ;;  %v932_v56 = vpack.c.bf16 %v156_v47, %v155_v46 }
  0x1c   :  { %889 = vmatprep.subr.bf16.mxu1 %v888_v18  ;;  %v107_v53 = vld [vmem:[%s1507_s1 + $0x210] sm:$0xff]  ;;  %v140_v57 = vld [vmem:[%s1507_s1 + $0x318] sm:$0xff]  ;;  %v125_v58 = vld [vmem:[%s1507_s1 + $0x2a0] sm:$0xff] }
  0x1d   :  { %859 = vmatpush3.bf16.msra.mxu0 %v858_v24  ;;  %v139_v55 = vld [vmem:[%s1507_s1 + $0x310] sm:$0xff]  ;;  %v126_v59 = vld [vmem:[%s1507_s1 + $0x2a8] sm:$0xff]  ;;  %v157_v60 = vld [vmem:[%s1507_s1 + $0x3a0] sm:$0xff]  ;;  %v902_v62 = vpack.c.bf16 %v108_v54, %v107_v53 }
  0x1e   :  { %861 = vmatprep.subr.bf16.mxu0 %v860_v26  ;;  %v158_v61 = vld [vmem:[%s1507_s1 + $0x3a8] sm:$0xff]  ;;  %v934_v63 = vpack.c.bf16 %v140_v57, %v139_v55  ;;  %v904_v0 = vpack.c.bf16 %v126_v59, %v125_v58  ;;  %v109_v1 = vld [vmem:[%s1507_s1 + $0x220] sm:$0xff]  ;;  %v127_v6 = vld [vmem:[%s1507_s1 + $0x2b0] sm:$0xff] }
  0x1f   :  { %891 = vmatpush3.bf16.msra.mxu1 %v890_v25  ;;  %v110_v2 = vld [vmem:[%s1507_s1 + $0x228] sm:$0xff]  ;;  %v141_v3 = vld [vmem:[%s1507_s1 + $0x320] sm:$0xff]  ;;  %v936_v4 = vpack.c.bf16 %v158_v61, %v157_v60  ;;  %v128_v7 = vld [vmem:[%s1507_s1 + $0x2b8] sm:$0xff] }
  0x20   :  { %893 = vmatprep.subr.bf16.mxu1 %v892_v30  ;;  %v142_v5 = vld [vmem:[%s1507_s1 + $0x328] sm:$0xff]  ;;  %v159_v8 = vld [vmem:[%s1507_s1 + $0x3b0] sm:$0xff]  ;;  %v160_v9 = vld [vmem:[%s1507_s1 + $0x3b8] sm:$0xff]  ;;  %v906_v10 = vpack.c.bf16 %v110_v2, %v109_v1  ;;  %v908_v15 = vpack.c.bf16 %v128_v7, %v127_v6 }
  0x21   :  { %863 = vmatpush3.bf16.msra.mxu0 %v862_v36  ;;  %v111_v11 = vld [vmem:[%s1507_s1 + $0x230] sm:$0xff]  ;;  %v112_v12 = vld [vmem:[%s1507_s1 + $0x238] sm:$0xff]  ;;  %v34_v13 = vld [vmem:[%s1506_s0 + $0x48] sm:$0xff]  ;;  %v938_v14 = vpack.c.bf16 %v142_v5, %v141_v3  ;;  %v940_v19 = vpack.c.bf16 %v160_v9, %v159_v8 }
  0x22   :  { %897 = vmatprep.subr.bf16.mxu0 %v896_v38  ;;  %v143_v16 = vld [vmem:[%s1507_s1 + $0x330] sm:$0xff]  ;;  %v144_v17 = vld [vmem:[%s1507_s1 + $0x338] sm:$0xff]  ;;  %v33_v18 = vld [vmem:[%s1506_s0 + $0x40] sm:$0xff]  ;;  %v910_v26 = vpack.c.bf16 %v112_v12, %v111_v11 }
  0x23   :  { %895 = vmatpush3.bf16.msra.mxu1 %v894_v37  ;;  %v129_v20 = vld [vmem:[%s1507_s1 + $0x2c0] sm:$0xff]  ;;  %v130_v21 = vld [vmem:[%s1507_s1 + $0x2c8] sm:$0xff]  ;;  %v36_v22 = vld [vmem:[%s1506_s0 + $0x58] sm:$0xff]  ;;  %v942_v29 = vpack.c.bf16 %v144_v17, %v143_v16 }
  0x24   :  { %929 = vmatprep.subr.bf16.mxu1 %v928_v42  ;;  %247 = vmatmul.mubr.f32.vlgmr.msra.gmra.mrb[0].mxu0 %v25_v48  ;;  %v161_v23 = vld [vmem:[%s1507_s1 + $0x3c0] sm:$0xff]  ;;  %v162_v24 = vld [vmem:[%s1507_s1 + $0x3c8] sm:$0xff]  ;;  %v35_v25 = vld [vmem:[%s1506_s0 + $0x50] sm:$0xff]  ;;  %v912_v30 = vpack.c.bf16 %v130_v21, %v129_v20 }
  0x25   :  { %899 = vmatpush3.bf16.msra.mxu0 %v898_v49  ;;  %251 = vmatprep.mubr.f32.mxu0 %v34_v13  ;;  %v113_v27 = vld [vmem:[%s1507_s1 + $0x240] sm:$0xff]  ;;  %v114_v28 = vld [vmem:[%s1507_s1 + $0x248] sm:$0xff]  ;;  %v944_v34 = vpack.c.bf16 %v162_v24, %v161_v23  ;;  %v131_v35 = vld [vmem:[%s1507_s1 + $0x2d0] sm:$0xff] }
  0x26   :  { %322 = vmatmul.mubr.f32.vlgmr.msra.gmra.mrb[0].mxu1 %v27_v50  ;;  %901 = vmatprep.subr.bf16.mxu0 %v900_v52  ;;  %v145_v31 = vld [vmem:[%s1507_s1 + $0x340] sm:$0xff]  ;;  %v146_v32 = vld [vmem:[%s1507_s1 + $0x348] sm:$0xff]  ;;  %v132_v36 = vld [vmem:[%s1507_s1 + $0x2d8] sm:$0xff]  ;;  %v914_v40 = vpack.c.bf16 %v114_v28, %v113_v27 }
  0x27   :  { %931 = vmatpush3.bf16.msra.mxu1 %v930_v51  ;;  %326 = vmatprep.mubr.f32.mxu1 %v36_v22  ;;  %v30_v33 = vld [vmem:[%s1506_s0 + $0x28] sm:$0xff]  ;;  %v32_v37 = vld [vmem:[%s1506_s0 + $0x38] sm:$0xff]  ;;  %v163_v38 = vld [vmem:[%s1507_s1 + $0x3d0] sm:$0xff] }
  0x28   :  { %933 = vmatprep.subr.bf16.mxu1 %v932_v56  ;;  %252 = vmatmul.mubr.f32.gmra.mrb[2].mxu0 %v33_v18  ;;  %v164_v39 = vld [vmem:[%s1507_s1 + $0x3d8] sm:$0xff] }
  0x29   :  { %903 = vmatpush3.bf16.msra.mxu0 %v902_v62  ;;  %396 = vmatprep.mubr.f32.mxu0 %v30_v33 }
  0x2a   :  { %905 = vmatprep.subr.bf16.mxu0 %v904_v0  ;;  %327 = vmatmul.mubr.f32.gmra.mrb[2].mxu1 %v35_v25 }
  0x2b   :  { %935 = vmatpush3.bf16.msra.mxu1 %v934_v63  ;;  %471 = vmatprep.mubr.f32.mxu1 %v32_v37 }
  0x2c   :  { %937 = vmatprep.subr.bf16.mxu1 %v936_v4 }
  0x2d   :  { %907 = vmatpush3.bf16.msra.mxu0 %v906_v10 }
  0x2e   :  { %909 = vmatprep.subr.bf16.mxu0 %v908_v15 }
  0x2f   :  { %939 = vmatpush3.bf16.msra.mxu1 %v938_v14 }
  0x30   :  { %941 = vmatprep.subr.bf16.mxu1 %v940_v19 }
  0x31   :  { %911 = vmatpush3.bf16.msra.mxu0 %v910_v26 }
  0x32   :  { %12 = vsyncpa [#allocation4], 0  ;;  %913 = vmatprep.subr.bf16.mxu0 %v912_v30  ;;  %v946_v41 = vpack.c.bf16 %v146_v32, %v145_v31  ;;  %v916_v42 = vpack.c.bf16 %v132_v36, %v131_v35  ;;  %v115_v43 = vld [vmem:[%s1507_s1 + $0x250] sm:$0xff]  ;;  %v116_v44 = vld [vmem:[%s1507_s1 + $0x258] sm:$0xff]  ;;  %v948_v46 = vpack.c.bf16 %v164_v39, %v163_v38  ;;  %vm492_vm0 = vcmask 261120  }
  0x33   :  { %943 = vmatpush3.bf16.msra.mxu1 %v942_v29  ;;  %v147_v45 = vld [vmem:[%s1507_s1 + $0x350] sm:$0xff]  ;;  %v148_v47 = vld [vmem:[%s1507_s1 + $0x358] sm:$0xff]  ;;  %v133_v48 = vld [vmem:[%s1507_s1 + $0x2e0] sm:$0xff]  ;;  %v918_v52 = vpack.c.bf16 %v116_v44, %v115_v43  ;;  %vm641_vm3 = vcmask 0  }
  0x34   :  { %945 = vmatprep.subr.bf16.mxu1 %v944_v34  ;;  %v134_v49 = vld [vmem:[%s1507_s1 + $0x2e8] sm:$0xff]  ;;  %v165_v50 = vld [vmem:[%s1507_s1 + $0x3e0] sm:$0xff]  ;;  %v950_v53 = vpack.c.bf16 %v148_v47, %v147_v45  ;;  %v135_v60 = vld [vmem:[%s1507_s1 + $0x2f0] sm:$0xff] }
  0x35   :  { %v166_v51 = vld [vmem:[%s1507_s1 + $0x3e8] sm:$0xff]  ;;  %915 = vmatpush3.bf16.msra.mxu0 %v914_v40  ;;  %v920_v54 = vpack.c.bf16 %v134_v49, %v133_v48  ;;  %v117_v55 = vld [vmem:[%s1507_s1 + $0x260] sm:$0xff]  ;;  %v136_v61 = vld [vmem:[%s1507_s1 + $0x2f8] sm:$0xff] }
  0x36   :  { %917 = vmatprep.subr.bf16.mxu0 %v916_v42  ;;  %v118_v56 = vld [vmem:[%s1507_s1 + $0x268] sm:$0xff]  ;;  %v149_v57 = vld [vmem:[%s1507_s1 + $0x360] sm:$0xff]  ;;  %v952_v58 = vpack.c.bf16 %v166_v51, %v165_v50  ;;  %v167_v62 = vld [vmem:[%s1507_s1 + $0x3f0] sm:$0xff]  ;;  %v924_v2 = vpack.c.bf16 %v136_v61, %v135_v60 }
  0x37   :  { %947 = vmatpush3.bf16.msra.mxu1 %v946_v41  ;;  %v150_v59 = vld [vmem:[%s1507_s1 + $0x368] sm:$0xff]  ;;  %v168_v63 = vld [vmem:[%s1507_s1 + $0x3f8] sm:$0xff]  ;;  %v922_v0 = vpack.c.bf16 %v118_v56, %v117_v55  ;;  %v119_v3 = vld [vmem:[%s1507_s1 + $0x270] sm:$0xff] }
  0x38   :  { %949 = vmatprep.subr.bf16.mxu1 %v948_v46  ;;  %v954_v1 = vpack.c.bf16 %v150_v59, %v149_v57  ;;  %v120_v4 = vld [vmem:[%s1507_s1 + $0x278] sm:$0xff]  ;;  %v956_v5 = vpack.c.bf16 %v168_v63, %v167_v62  ;;  %v151_v6 = vld [vmem:[%s1507_s1 + $0x370] sm:$0xff]  ;;  %v29_v10 = vld [vmem:[%s1506_s0 + $0x20] sm:$0xff] }
  0x39   :  { %919 = vmatpush3.bf16.msra.mxu0 %v918_v52  ;;  %v152_v7 = vld [vmem:[%s1507_s1 + $0x378] sm:$0xff]  ;;  %v926_v8 = vpack.c.bf16 %v120_v4, %v119_v3  ;;  %v31_v11 = vld [vmem:[%s1506_s0 + $0x30] sm:$0xff]  ;;  %v38_v12 = vld [vmem:[%s1506_s0 + $0x68] sm:$0xff] }
  0x3a   :  { %921 = vmatprep.subr.bf16.mxu0 %v920_v54  ;;  %v958_v9 = vpack.c.bf16 %v152_v7, %v151_v6  ;;  %v40_v13 = vld [vmem:[%s1506_s0 + $0x78] sm:$0xff]  ;;  %v37_v14 = vld [vmem:[%s1506_s0 + $0x60] sm:$0xff]  ;;  %v39_v15 = vld [vmem:[%s1506_s0 + $0x70] sm:$0xff]  ;;  %v499_v6 = vstv %s1511_s5  ;;  %s1001_s5 = smov [#allocation3]  }
  0x3b   :  { %951 = vmatpush3.bf16.msra.mxu1 %v950_v53  ;;  %v171_v16 = vld [vmem:[%s1510_s4] sm:$0xff]  ;;  %v172_v17 = vld [vmem:[%s1510_s4 + $0x8] sm:$0xff]  ;;  %v173_v19 = vld [vmem:[%s1510_s4 + $0x10] sm:$0xff]  ;;  %s649_s30 = sshll.u32 %s1001_s5, 4  ;;  %s650_s30 = int_to_ptr.vmem [resolvable:$true] %s649_s30 }
  0x3c   :  { %953 = vmatprep.subr.bf16.mxu1 %v952_v58  ;;  %v960_v18 = vpack.c.bf16 %v172_v17, %v171_v16  ;;  %v174_v20 = vld [vmem:[%s1510_s4 + $0x18] sm:$0xff]  ;;  %v657_v23 = vld [vmem:[%s1508_s2] ss:$0 sm:$0xff]  ;;  %s977_s7 = scalar_lea.vmem %s650_s30, 16  ;;  %s981_s8 = scalar_lea.vmem %s650_s30, 32 }
  0x3d   :  { %923 = vmatpush3.bf16.msra.mxu0 %v922_v0  ;;  %v964_v21 = vpack.c.bf16 %v174_v20, %v173_v19  ;;  %v658_v55 = vld [vmem:[%s1509_s3] ss:$0 sm:$0xff]  ;;  %p978_p0 = scmp.ne.s32.totalorder %s650_s30, %s977_s7  ;;  %p982_p1 = scmp.lt.s32.totalorder %s650_s30, %s650_s30 }
  0x3e   :  { %925 = vmatprep.subr.bf16.mxu0 %v924_v2  ;;  %p983_p2 = scmp.lt.s32.totalorder %s981_s8, %s977_s7 }
  0x3f   :  { %955 = vmatpush3.bf16.msra.mxu1 %v954_v1 }
  0x40   :  { %957 = vmatprep.subr.bf16.mxu1 %v956_v5  ;;  %p984_p3 = por %p983_p2, %p982_p1 }
  0x41   :  { %927 = vmatpush3.bf16.msra.mxu0 %v926_v8 }
  0x42   :  { %961 = vmatprep.subr.bf16.mxu0 %v960_v18  ;;  %p985_p4 = pnand %p984_p3, %p978_p0 }
  0x43   :  { %959 = vmatpush3.bf16.msra.mxu1 %v958_v9 }
  0x44   :  { %397 = vmatmul.mubr.f32.vlgmr.msra.gmra.mrb[4].mxu0 %v29_v10 }
  0x45   :  { %401 = vmatprep.mubr.f32.mxu0 %v38_v12  ;;  %963 = vmatpush3.bf16.msra.mxu0 %v960_v18 }
  0x46   :  { %472 = vmatmul.mubr.f32.vlgmr.msra.gmra.mrb[4].mxu1 %v31_v11  ;;  %965 = vmatprep.subr.bf16.mxu0 %v964_v21 }
  0x47   :  { %476 = vmatprep.mubr.f32.mxu1 %v40_v13 }
  0x48   :  { %402 = vmatmul.mubr.f32.gmra.mrb[6].mxu0 %v37_v14 }
  0x49   :  { %967 = vmatpush3.bf16.msra.mxu0 %v964_v21 }
  0x4a   :  { %477 = vmatmul.mubr.f32.gmra.mrb[6].mxu1 %v39_v15 }
  0xf7   :  { %v695_v22 = vpop.f32.mrb[0].mxu0 }
  0xf8   :  { %v696_v24 = vpop.f32.mrb[1].mxu0 }
  0xf9   :  { %v733_v25 = vpop.f32.mrb[0].mxu1  ;;  %v697_v26 = vadd.f32 %v696_v24, %v695_v22 }
  0xfa   :  { %v734_v27 = vpop.f32.mrb[1].mxu1 }
  0xfb   :  { %v735_v28 = vadd.f32 %v734_v27, %v733_v25  ;;  %v249_v29 = vadd.f32 %v697_v26, %v657_v23  ;;  %v698_v31 = vpop.f32.mrb[2].mxu0 }
  0xfc   :  { %v699_v32 = vpop.f32.mrb[3].mxu0 }
  0xfd   :  { %v324_v30 = vadd.f32 %v735_v28, %v249_v29  ;;  %v736_v33 = vpop.f32.mrb[2].mxu1  ;;  %v700_v34 = vadd.f32 %v699_v32, %v698_v31 }
  0xfe   :  { %v737_v35 = vpop.f32.mrb[3].mxu1 }
  0xff   :  { %v738_v36 = vadd.f32 %v737_v35, %v736_v33  ;;  %v254_v37 = vadd.f32 %v700_v34, %v657_v23 }
 0x101   :  { %v329_v38 = vadd.f32 %v738_v36, %v254_v37 }
 0x117   :  { %v771_v39 = vpop.f32.mrb[4].mxu0 }
 0x118   :  { %v772_v40 = vpop.f32.mrb[5].mxu0 }
 0x119   :  { %v809_v41 = vpop.f32.mrb[4].mxu1  ;;  %v773_v42 = vadd.f32 %v772_v40, %v771_v39 }
 0x11a   :  { %v810_v43 = vpop.f32.mrb[5].mxu1 }
 0x11b   :  { %v811_v44 = vadd.f32 %v810_v43, %v809_v41  ;;  %v399_v45 = vadd.f32 %v773_v42, %v324_v30  ;;  %v774_v46 = vpop.f32.mrb[6].mxu0 }
 0x11c   :  { %v775_v47 = vpop.f32.mrb[7].mxu0 }
 0x11d   :  { %v812_v48 = vpop.f32.mrb[6].mxu1  ;;  %v474_v49 = vadd.f32 %v811_v44, %v399_v45  ;;  %v776_v50 = vadd.f32 %v775_v47, %v774_v46 }
 0x11e   :  { %v813_v51 = vpop.f32.mrb[7].mxu1 }
 0x11f   :  { %v814_v52 = vadd.f32 %v813_v51, %v812_v48  ;;  %969 = vtanh.f32 %v474_v49  ;;  %v404_v53 = vadd.f32 %v776_v50, %v329_v38 }
 0x121   :  { %v479_v54 = vadd.f32 %v814_v52, %v404_v53 }
 0x123   :  { %971 = vtanh.f32 %v479_v54 }
 0x129   :  { %v970_v56 = vpop.eup %969 }
 0x12a   :  { %v490_v57 = vmul.f32 %v970_v56, %v658_v55  ;;  %v502_v58 = vmul.f32 %v970_v56, %v970_v56 }
 0x12c   :  { %v493_v59 = vsel %vm492_vm0, %v490_v57, 0.0  ;;  %v504_v60 = vsub.f32 1.0, %v502_v58 }
 0x12d   :  { %v972_v61 = vpop.eup %971  ;;  %494 = vadd.xlane.f32.xlu0 %v493_v59 }
 0x12e   :  { %v503_v62 = vmul.f32 %v972_v61, %v972_v61  ;;  %v506_v63 = vmul.f32 %v658_v55, %v504_v60 }
 0x130   :  { %v505_v0 = vsub.f32 1.0, %v503_v62  ;;  %829 = vmatprep.mubr.msk.f32.mxu0 %vm492_vm0, %v506_v63 }
 0x132   :  { %v507_v1 = vmul.f32 %v658_v55, %v505_v0 }
 0x134   :  { %830 = vmatmul.mubr.msk.f32.vlgmr.msra.gmra.mrb[8].mxu0 %vm492_vm0, %v507_v1 }
 0x1ba   :  { %v495_v7 = vpop.xlane.xlu0 %494 }
 0x1bb   :  { %v500_v8 = vadd.f32 %v499_v6, %v495_v7 }
 0x1bd   :  { %v661_v9 = vadd.f32 -1.0, %v500_v8 }
 0x1bf   :  { %v615_v12 = vmul.f32 1.442695, %v661_v9 }
 0x207   :  { %v831_v2 = vpop.f32.mrb[8].mxu0 }
 0x208   :  { %v580_v3 = vpop.f32.mrb[9].mxu0 }
 0x209   :  { %v589_v4 = vmul.f32 %v580_v3, %v506_v63 }
 0x20b   :  { %v591_v5 = vsel %vm492_vm0, %v589_v4, 0.0 }
 0x20c   :  { %592 = vadd.xlane.f32.xlu0 %v591_v5 }
 0x299   :  { %v593_v10 = vpop.xlane.xlu0 %592 }
 0x29a   :  { %v597_v11 = vmax.f32 %v593_v10, 0.0 }
 0x29c   :  { %973 = vrsqrt.f32 %v597_v11  ;;  %vm601_vm1 = vcmp.eq.f32.partialorder %v597_v11, inf  ;;  %v604_v15 = vand.u32 2147483648, %v597_v11  ;;  %vm603_vm2 = vcmp.eq.f32.partialorder %v597_v11, 0.0 }
 0x29d   :  { %975 = vpow2.f32 %v615_v12 }
 0x2a6   :  { %v974_v13 = vpop.eup %973 }
 0x2a7   :  { %v600_v14 = vmul.f32 %v974_v13, %v597_v11  ;;  %v976_v17 = vpop.eup %975 }
 0x2a9   :  { %v602_v16 = vsel %vm601_vm1, %v597_v11, %v600_v14 }
 0x2aa   :  { %v605_v18 = vsel %vm603_vm2, %v604_v15, %v602_v16 }
 0x2ab   :  { %v619_v19 = vmul.f32 %v976_v17, %v605_v18 }
 0x2ad   :  { %v621_v20 = vmul.f32 %v976_v17, %v619_v19 }
 0x2af   :  { %v635_v21 = vrot.slane %v621_v20, 4 }
 0x2b1   :  { %v636_v22 = vadd.f32 %v635_v21, %v621_v20 }
 0x2b3   :  { %v637_v23 = vrot.slane %v636_v22, 2 }
 0x2b5   :  { %v638_v24 = vadd.f32 %v637_v23, %v636_v22 }
 0x2b7   :  { %v639_v25 = vrot.slane %v638_v24, 1 }
 0x2b9   :  { %v640_v26 = vadd.f32 %v639_v25, %v638_v24 }
 0x2bb   :  { %642 = vst.msk [vmem:[#allocation3] sm:$0x1] %vm641_vm3, %v640_v26 }
 0x2bc   :  { %988 = shalt.err (!%p985_p4)
}
 0x2bd   :  { %s989_s11 = scalar_lea.hbm %s1512_s6, 16 }
 0x2be   :  { %p990_p5 = scmp.ne.s32.totalorder %s1512_s6, %s989_s11  ;;  %p993_p6 = scmp.lt.u32.totalorder %s989_s11, %s1512_s6 }
 0x2c0   :  { %p995_p7 = pnand %p993_p6, %p990_p5 }
 0x2c2   :  { %998 = shalt.err (!%p995_p7)
}
 0x2c3   :  { %652 = dma.vmem_to_hbm [thread:$0]  %s650_s30, 16, %s1512_s6, [#allocation4]  }
 0x2c4   :  { %999 = dma.done.wait [#allocation4], 16  }
 0x2c5   :  { %1000 = vsyncadd [#allocation4], 4294967280 }
 0x2c6   :  { %656 = vsyncpa [#allocation4], 1 }

</bundles_post_ra>
